<compile_context>
chip_gen: v5e
topology: v5e:2x2
jax: 0.10.0
libtpu: 0.0.40
codegen_flags: <defaults>
</compile_context>

<pallas_src>
import jax
import jax.numpy as jnp
from jax.experimental import pallas as pl
from jax.experimental.pallas import tpu as pltpu

STATE_DIM = 4      # CartPole-v1 observation_space.shape[0]
HIDDEN_DIM = 128


def _default_tanh_dtype():
    """bf16 EUP exists on v6e / v7x; on v5e and older a bf16 tanh only adds
    pack/unpack VPU work, so keep f32 there."""
    try:
        kind = jax.devices()[0].device_kind.lower()
    except Exception:
        return jnp.float32
    return jnp.bfloat16 if ("v6" in kind or "v7" in kind) else jnp.float32


def _make_value_net_kernel(tanh_dtype):
    def kernel(x_ref, w1t_ref, b1_ref, w2t_ref, b2_ref, w3_ref, b3_ref, o_ref):
        """One batch tile (batch on the lane axis):
           o(1,tb) = w3 . tanh(W2^T tanh(W1^T x + b1) + b2) + b3."""
        x = x_ref[...]                           # (S, tb)  f32 states
        w1t = w1t_ref[...]                       # (H, S)   f32

        # fc1: S (=4) broadcast FMAs on the VPU, exact f32 (no cast of the raw
        # states, MXU stays idle for this tiny-K contraction).
        pre1 = b1_ref[...]                       # (H, 1) -> broadcasts to (H, tb)
        for k in range(x.shape[0]):
            pre1 = pre1 + w1t[:, k:k + 1] * x[k:k + 1, :]
        h1 = jnp.tanh(pre1.astype(tanh_dtype))   # (H, tb) on the EUP

        # fc2: MXU matmul (bf16 operands by default), f32 accumulation.
        w2t = w2t_ref[...]                       # (H, H), MXU dtype
        pre2 = jnp.dot(w2t, h1.astype(w2t.dtype),
                       preferred_element_type=jnp.float32) + b2_ref[...]
        h2 = jnp.tanh(pre2.astype(tanh_dtype))   # (H, tb)

        # fc3 (out_features == 1): VPU multiply + cross-sublane reduce -> a
        # lane-dense (1, tb) row; b3 comes from SMEM as a scalar.
        v = jnp.sum(h2.astype(jnp.float32) * w3_ref[...], axis=0,
                    keepdims=True) + b3_ref[0]
        o_ref[...] = v.astype(o_ref.dtype)
    return kernel


def value_net_forward(x, params, *, block_rows=None,
                      mxu_dtype=jnp.bfloat16, tanh_dtype=None):
    """x: (B, STATE_DIM) float32. Returns (B, 1) float32.

    block_rows: batch columns per grid step. Default: single step for B<=4096,
                else 2048 (lane-aligned). Per-step VMEM stays at a few MiB.
    mxu_dtype:  dtype of the fc2 MXU operands (accumulation is always f32).
    tanh_dtype: dtype the two tanh activations run in (default: bf16 on
                v6e/v7x, f32 on v5e/older).
    """
    w1, b1, w2, b2, w3, b3 = params
    B, sd = x.shape
    H = w1.shape[1]
    assert sd == w1.shape[0]
    if tanh_dtype is None:
        tanh_dtype = _default_tanh_dtype()

    # Batch-in-lanes layout: states on sublanes, batch on the (dense) lane axis.
    x_t = x.T.astype(jnp.float32)                        # (sd, B)

    # Tiling: single grid step for small/medium B (block == full dims, so no
    # (8,128) divisibility constraint and no padding copy); otherwise
    # lane-aligned tiles.
    if block_rows is None:
        block_rows = B if B <= 4096 else 2048
    if block_rows >= B:
        tb, num_tiles, b_pad = B, 1, B
    else:
        tb = max(128, (block_rows // 128) * 128)
        num_tiles = pl.cdiv(B, tb)
        b_pad = num_tiles * tb
        if b_pad != B:
            # Tiny copy (sd * pad floats); only hit on the multi-tile path.
            x_t = jnp.pad(x_t, ((0, 0), (0, b_pad - B)))

    # Parameter layouts (all VMEM-resident across grid steps).
    w1t = w1.T.astype(jnp.float32)                       # (H, sd) exact-f32 fc1
    b1c = b1.reshape(H, 1).astype(jnp.float32)           # (H, 1)
    w2t = w2.T.astype(mxu_dtype)                         # (H, H)  MXU operand
    b2c = b2.reshape(H, 1).astype(jnp.float32)           # (H, 1)
    w3c = w3.reshape(H, 1).astype(jnp.float32)           # (H, 1)  value head
    b3s = b3.reshape(1).astype(jnp.float32)              # scalar -> SMEM

    resident = lambda a: pl.BlockSpec(a.shape, lambda i: (0, 0))

    out = pl.pallas_call(
        _make_value_net_kernel(tanh_dtype),
        out_shape=jax.ShapeDtypeStruct((1, b_pad), jnp.float32),
        grid=(num_tiles,),
        in_specs=[
            pl.BlockSpec((sd, tb), lambda i: (0, i)),    # x: lane-dense batch tile
            resident(w1t), resident(b1c),                # VMEM-resident params
            resident(w2t), resident(b2c),
            resident(w3c),
            pl.BlockSpec(memory_space=pltpu.MemorySpace.SMEM),  # b3 scalar
        ],
        out_specs=pl.BlockSpec((1, tb), lambda i: (0, i)),      # lane-dense row
        compiler_params=pltpu.CompilerParams(
            dimension_semantics=("parallel",)),
    )(x_t, w1t, b1c, w2t, b2c, w3c, b3s)

    return out.reshape(b_pad, 1)[:B]


def init_params(key):
    """Deterministic init mimicking torch.nn.Linear default (U[-1/sqrt(fan_in), +])."""
    def linear(key, fan_in, fan_out):
        kw, kb = jax.random.split(key)
        bound = 1.0 / jnp.sqrt(float(fan_in))
        w = jax.random.uniform(kw, (fan_in, fan_out), jnp.float32, -bound, bound)
        b = jax.random.uniform(kb, (fan_out,), jnp.float32, -bound, bound)
        return w, b

    k1, k2, k3 = jax.random.split(key, 3)
    w1, b1 = linear(k1, STATE_DIM, HIDDEN_DIM)
    w2, b2 = linear(k2, HIDDEN_DIM, HIDDEN_DIM)
    w3, b3 = linear(k3, HIDDEN_DIM, 1)
    return (w1, b1, w2, b2, w3, b3)


def value_net_ref(x, params, mxu_dtype=jnp.float32, tanh_dtype=jnp.float32):
    """Pure-JAX reference; dtypes mirror the kernel's arithmetic when matched."""
    w1, b1, w2, b2, w3, b3 = params
    pre1 = jnp.dot(x.astype(jnp.float32), w1.astype(jnp.float32)) + b1[None, :]
    h1 = jnp.tanh(pre1.astype(tanh_dtype))
    pre2 = jnp.dot(h1.astype(mxu_dtype), w2.astype(mxu_dtype),
                   preferred_element_type=jnp.float32) + b2[None, :]
    h2 = jnp.tanh(pre2.astype(tanh_dtype))
    return (jnp.dot(h2.astype(jnp.float32), w3.astype(jnp.float32))
            + b3[None, :])


if __name__ == "__main__":
    key = jax.random.PRNGKey(0)
    kp, kx = jax.random.split(key)
    params = init_params(kp)

    mxu_dtype = jnp.bfloat16
    tanh_dtype = _default_tanh_dtype()
    # bf16 tanh (v6e/v7x) differs from the f32 path at the bf16-ulp level.
    tol_m = 2.5e-2 if tanh_dtype == jnp.bfloat16 else 5e-3

    # B=256 CartPole states: single grid step, batch on the lane axis, no padding.
    B = 256
    x = jax.random.normal(kx, (B, STATE_DIM), jnp.float32)
    out = value_net_forward(x, params)
    jax.block_until_ready(out)
    assert out.shape == (B, 1)

    ref_matched = value_net_ref(x, params, mxu_dtype=mxu_dtype, tanh_dtype=tanh_dtype)
    ref_f32 = value_net_ref(x, params)
    assert jnp.allclose(out, ref_matched, atol=tol_m, rtol=tol_m), "mismatch (matched ref)"
    assert jnp.allclose(out, ref_f32, atol=8e-2, rtol=8e-2), "mismatch (f32 ref)"

    # Ragged batch (B=50): still a single step, block == full dims, no pad copy.
    B2 = 50
    x2 = jax.random.normal(jax.random.PRNGKey(1), (B2, STATE_DIM), jnp.float32)
    out2 = value_net_forward(x2, params)
    jax.block_until_ready(out2)
    assert out2.shape == (B2, 1)
    assert jnp.allclose(
        out2, value_net_ref(x2, params, mxu_dtype=mxu_dtype, tanh_dtype=tanh_dtype),
        atol=tol_m, rtol=tol_m), "mismatch (ragged batch)"

    # Forced multi-tile path: 3 lane-aligned 128-column tiles + padded tail.
    B3 = 300
    x3 = jax.random.normal(jax.random.PRNGKey(2), (B3, STATE_DIM), jnp.float32)
    out3 = value_net_forward(x3, params, block_rows=128)
    jax.block_until_ready(out3)
    assert out3.shape == (B3, 1)
    assert jnp.allclose(
        out3, value_net_ref(x3, params, mxu_dtype=mxu_dtype, tanh_dtype=tanh_dtype),
        atol=tol_m, rtol=tol_m), "mismatch (tiled batch)"

    print("KERNEL_OK")
</pallas_src>

<mosaic_0001>
module attributes {stable_mosaic.version = 11 : i64} {
  func.func @kernel(%arg0: i32, %arg1: memref<4x256xf32, #tpu.memory_space<vmem>>, %arg2: memref<128x4xf32, #tpu.memory_space<vmem>>, %arg3: memref<128x1xf32, #tpu.memory_space<vmem>>, %arg4: memref<128x128xbf16, #tpu.memory_space<vmem>>, %arg5: memref<128x1xf32, #tpu.memory_space<vmem>>, %arg6: memref<128x1xf32, #tpu.memory_space<vmem>>, %arg7: memref<1xf32, #tpu.memory_space<smem>>, %arg8: memref<1x256xf32, #tpu.memory_space<vmem>>) attributes {dimension_semantics = [#tpu.dimension_semantics<parallel>], iteration_bounds = array<i64: 1>, scalar_prefetch = 0 : i64, scratch_operands = 0 : i64, tpu.core_type = #tpu.core_type<tc>, window_params = [{transform_indices = @transform_0, window_bounds = array<i64: 4, 256>}, {pipeline_mode = #tpu.pipeline_mode<synchronous>, transform_indices = @transform_1, window_bounds = array<i64: 128, 4>}, {pipeline_mode = #tpu.pipeline_mode<synchronous>, transform_indices = @transform_2, window_bounds = array<i64: 128, 1>}, {pipeline_mode = #tpu.pipeline_mode<synchronous>, transform_indices = @transform_3, window_bounds = array<i64: 128, 128>}, {pipeline_mode = #tpu.pipeline_mode<synchronous>, transform_indices = @transform_4, window_bounds = array<i64: 128, 1>}, {pipeline_mode = #tpu.pipeline_mode<synchronous>, transform_indices = @transform_5, window_bounds = array<i64: 128, 1>}, {transform_indices = @transform_6, window_bounds = array<i64: 1>}, {transform_indices = @transform_7, window_bounds = array<i64: 1, 256>}]} {
    %c0 = arith.constant 0 : index
    %c0_0 = arith.constant 0 : index
    %0 = vector.load %arg1[%c0, %c0_0] : memref<4x256xf32, #tpu.memory_space<vmem>>, vector<4x256xf32>
    %c0_1 = arith.constant 0 : index
    %c0_2 = arith.constant 0 : index
    %1 = vector.load %arg2[%c0_1, %c0_2] : memref<128x4xf32, #tpu.memory_space<vmem>>, vector<128x4xf32>
    %c0_3 = arith.constant 0 : index
    %c0_4 = arith.constant 0 : index
    %2 = vector.load %arg3[%c0_3, %c0_4] : memref<128x1xf32, #tpu.memory_space<vmem>>, vector<128x1xf32>
    %3 = vector.extract_strided_slice %1 {offsets = [0, 0], sizes = [128, 1], strides = [1, 1]} : vector<128x4xf32> to vector<128x1xf32>
    %4 = vector.extract_strided_slice %0 {offsets = [0, 0], sizes = [1, 256], strides = [1, 1]} : vector<4x256xf32> to vector<1x256xf32>
    %5 = vector.broadcast %3 : vector<128x1xf32> to vector<128x256xf32>
    %6 = vector.broadcast %4 : vector<1x256xf32> to vector<128x256xf32>
    %7 = arith.mulf %5, %6 : vector<128x256xf32>
    %8 = vector.broadcast %2 : vector<128x1xf32> to vector<128x256xf32>
    %9 = arith.addf %8, %7 : vector<128x256xf32>
    %10 = vector.extract_strided_slice %1 {offsets = [0, 1], sizes = [128, 1], strides = [1, 1]} : vector<128x4xf32> to vector<128x1xf32>
    %11 = vector.extract_strided_slice %0 {offsets = [1, 0], sizes = [1, 256], strides = [1, 1]} : vector<4x256xf32> to vector<1x256xf32>
    %12 = vector.broadcast %10 : vector<128x1xf32> to vector<128x256xf32>
    %13 = vector.broadcast %11 : vector<1x256xf32> to vector<128x256xf32>
    %14 = arith.mulf %12, %13 : vector<128x256xf32>
    %15 = arith.addf %9, %14 : vector<128x256xf32>
    %16 = vector.extract_strided_slice %1 {offsets = [0, 2], sizes = [128, 1], strides = [1, 1]} : vector<128x4xf32> to vector<128x1xf32>
    %17 = vector.extract_strided_slice %0 {offsets = [2, 0], sizes = [1, 256], strides = [1, 1]} : vector<4x256xf32> to vector<1x256xf32>
    %18 = vector.broadcast %16 : vector<128x1xf32> to vector<128x256xf32>
    %19 = vector.broadcast %17 : vector<1x256xf32> to vector<128x256xf32>
    %20 = arith.mulf %18, %19 : vector<128x256xf32>
    %21 = arith.addf %15, %20 : vector<128x256xf32>
    %22 = vector.extract_strided_slice %1 {offsets = [0, 3], sizes = [128, 1], strides = [1, 1]} : vector<128x4xf32> to vector<128x1xf32>
    %23 = vector.extract_strided_slice %0 {offsets = [3, 0], sizes = [1, 256], strides = [1, 1]} : vector<4x256xf32> to vector<1x256xf32>
    %24 = vector.broadcast %22 : vector<128x1xf32> to vector<128x256xf32>
    %25 = vector.broadcast %23 : vector<1x256xf32> to vector<128x256xf32>
    %26 = arith.mulf %24, %25 : vector<128x256xf32>
    %27 = arith.addf %21, %26 : vector<128x256xf32>
    %28 = math.tanh %27 : vector<128x256xf32>
    %c0_5 = arith.constant 0 : index
    %c0_6 = arith.constant 0 : index
    %29 = vector.load %arg4[%c0_5, %c0_6] : memref<128x128xbf16, #tpu.memory_space<vmem>>, vector<128x128xbf16>
    %30 = arith.truncf %28 : vector<128x256xf32> to vector<128x256xbf16>
    %cst = arith.constant dense<0.000000e+00> : vector<128x256xf32>
    %31 = tpu.matmul %29, %30, %cst {dimension_numbers = #tpu.dot_dimension_numbers<[1], [0], [0], [1], [0, 0, 1, 1], [], []>} : vector<128x128xbf16>, vector<128x256xbf16>, vector<128x256xf32> -> vector<128x256xf32>
    %c0_7 = arith.constant 0 : index
    %c0_8 = arith.constant 0 : index
    %32 = vector.load %arg5[%c0_7, %c0_8] : memref<128x1xf32, #tpu.memory_space<vmem>>, vector<128x1xf32>
    %33 = vector.broadcast %32 : vector<128x1xf32> to vector<128x256xf32>
    %34 = arith.addf %31, %33 : vector<128x256xf32>
    %35 = math.tanh %34 : vector<128x256xf32>
    %c0_9 = arith.constant 0 : index
    %c0_10 = arith.constant 0 : index
    %36 = vector.load %arg6[%c0_9, %c0_10] : memref<128x1xf32, #tpu.memory_space<vmem>>, vector<128x1xf32>
    %37 = vector.broadcast %36 : vector<128x1xf32> to vector<128x256xf32>
    %38 = arith.mulf %35, %37 : vector<128x256xf32>
    %cst_11 = arith.constant dense<0.000000e+00> : vector<256xf32>
    %39 = vector.multi_reduction <add>, %38, %cst_11 [0] : vector<128x256xf32> to vector<256xf32>
    %40 = vector.shape_cast %39 : vector<256xf32> to vector<1x256xf32>
    %c0_12 = arith.constant 0 : index
    %41 = memref.load %arg7[%c0_12] : memref<1xf32, #tpu.memory_space<smem>>
    %42 = vector.broadcast %41 : f32 to vector<1x256xf32>
    %43 = arith.addf %40, %42 : vector<1x256xf32>
    %c0_13 = arith.constant 0 : index
    %c0_14 = arith.constant 0 : index
    %44 = vector.load %arg8[%c0_13, %c0_14] : memref<1x256xf32, #tpu.memory_space<vmem>>, vector<1x256xf32>
    tpu.vector_store %arg8[%c0_13, %c0_14], %43 {strides = array<i32>} : memref<1x256xf32, #tpu.memory_space<vmem>>, vector<1x256xf32>,
    return
  }
  func.func @transform_0(%arg0: i32) -> (i32, i32) {
    %c0_i32 = arith.constant 0 : i32
    %c0_i32_0 = arith.constant 0 : i32
    return %c0_i32, %arg0 : i32, i32
  }
  func.func @transform_1(%arg0: i32) -> (i32, i32) {
    %c0_i32 = arith.constant 0 : i32
    %c0_i32_0 = arith.constant 0 : i32
    %c0_i32_1 = arith.constant 0 : i32
    return %c0_i32, %c0_i32_0 : i32, i32
  }
  func.func @transform_2(%arg0: i32) -> (i32, i32) {
    %c0_i32 = arith.constant 0 : i32
    %c0_i32_0 = arith.constant 0 : i32
    %c0_i32_1 = arith.constant 0 : i32
    return %c0_i32, %c0_i32_0 : i32, i32
  }
  func.func @transform_3(%arg0: i32) -> (i32, i32) {
    %c0_i32 = arith.constant 0 : i32
    %c0_i32_0 = arith.constant 0 : i32
    %c0_i32_1 = arith.constant 0 : i32
    return %c0_i32, %c0_i32_0 : i32, i32
  }
  func.func @transform_4(%arg0: i32) -> (i32, i32) {
    %c0_i32 = arith.constant 0 : i32
    %c0_i32_0 = arith.constant 0 : i32
    %c0_i32_1 = arith.constant 0 : i32
    return %c0_i32, %c0_i32_0 : i32, i32
  }
  func.func @transform_5(%arg0: i32) -> (i32, i32) {
    %c0_i32 = arith.constant 0 : i32
    %c0_i32_0 = arith.constant 0 : i32
    %c0_i32_1 = arith.constant 0 : i32
    return %c0_i32, %c0_i32_0 : i32, i32
  }
  func.func @transform_6(%arg0: i32) -> i32 {
    %c0_i32 = arith.constant 0 : i32
    %c0_i32_0 = arith.constant 0 : i32
    return %c0_i32 : i32
  }
  func.func @transform_7(%arg0: i32) -> (i32, i32) {
    %c0_i32 = arith.constant 0 : i32
    %c0_i32_0 = arith.constant 0 : i32
    return %c0_i32, %arg0 : i32, i32
  }
}

</mosaic_0001>

<bundles_post_ra>
// kernel: tpu_custom_call.1
= control target key start
LH: loop header
LB: loop body
LE: loop exit
PB: predicated region body
PF: predicated region fallthrough
CT: control target
= control target key end

     0   :  { %v1465_v3 = vmov 0   ;;  %s2327_s0 = inlined_call_operand.vmem [shape: f32[4,256], index: 0, kind: input, shape index: {}]   ;;  %s2328_s1 = inlined_call_operand.vmem [shape: f32[128,4], index: 1, kind: input, shape index: {}]   ;;  %s2329_s2 = inlined_call_operand.vmem [shape: f32[128,1], index: 2, kind: input, shape index: {}]   ;;  %s2330_s3 = inlined_call_operand.vmem [shape: bf16[128,128], index: 3, kind: input, shape index: {}]   ;;  %s2331_s4 = inlined_call_operand.vmem [shape: f32[128,1], index: 4, kind: input, shape index: {}]   ;;  %s2332_s5 = inlined_call_operand.vmem [shape: f32[128,1], index: 5, kind: input, shape index: {}]   ;;  %s2333_s6 = inlined_call_operand.<no memory space> [shape: f32[1], index: 6, kind: input, shape index: {}]   ;;  %s2334_s7 = inlined_call_operand.hbm [shape: f32[1,256], index: 7, kind: output, shape index: {}]  }
   0x1   :  { %v1513_v0 = vld [vmem:[%s2328_s1 + $0x20] sm:$0xff]  ;;  %v1518_v1 = vld [vmem:[%s2328_s1 + $0x10] sm:$0xff]  ;;  %1296 = vset.pattern.permute.xlu2 %v1465_v3  ;;  %1295 = vset.pattern.permute.xlu1 %v1465_v3 }
   0x2   :  { %v1523_v2 = vld [vmem:[%s2328_s1] sm:$0xff]  ;;  %1294 = vset.pattern.permute.xlu0 %v1465_v3  ;;  %83 = vperm.xlu2 %1296, %v1513_v0  }
   0x3   :  { %73 = vperm.xlu1 %1295, %v1518_v1   ;;  %63 = vperm.xlu0 %1294, %v1523_v2  }
   0x4   :  { %13 = vsyncpa [#allocation4], 0  ;;  %v1534_v4 = vld [vmem:[%s2328_s1 + $0x28] sm:$0xff]  ;;  %v1539_v5 = vld [vmem:[%s2328_s1 + $0x18] sm:$0xff]  ;;  %v1466_v33 = vmov 1   ;;  %v1467_v50 = vmov 2  }
   0x5   :  { %v1544_v6 = vld [vmem:[%s2328_s1 + $0x8] sm:$0xff]  ;;  %v1552_v7 = vld [vmem:[%s2328_s1 + $0x40] sm:$0xff]  ;;  %v1557_v8 = vld [vmem:[%s2328_s1 + $0x38] sm:$0xff]  ;;  %s1224_s21 = sshll.u32 %s2334_s7, 4  ;;  %vm1209_vm0 = vcmask 1040384   ;;  %s1225_s21 = int_to_ptr.hbm [resolvable:$true] %s1224_s21 }
   0x6   :  { %v1562_v9 = vld [vmem:[%s2328_s1 + $0x30] sm:$0xff]  ;;  %v1570_v10 = vld [vmem:[%s2328_s1 + $0x58] sm:$0xff]  ;;  %v1580_v12 = vld [vmem:[%s2328_s1 + $0x48] sm:$0xff] }
   0x7   :  { %v1575_v11 = vld [vmem:[%s2328_s1 + $0x50] sm:$0xff]  ;;  %v1593_v14 = vld [vmem:[%s2328_s1 + $0x68] sm:$0xff]  ;;  %v1598_v15 = vld [vmem:[%s2328_s1 + $0x60] sm:$0xff] }
   0x8   :  { %v1588_v13 = vld [vmem:[%s2328_s1 + $0x70] sm:$0xff]  ;;  %v46_v16 = vld [vmem:[%s2329_s2 + $0x8] sm:$0xff]  ;;  %v45_v17 = vld [vmem:[%s2329_s2] sm:$0xff] }
   0x9   :  { %v1612_v18 = vld [vmem:[%s2328_s1 + $0x78] sm:$0xff]  ;;  %v49_v19 = vld [vmem:[%s2329_s2 + $0x20] sm:$0xff]  ;;  %v47_v21 = vld [vmem:[%s2329_s2 + $0x10] sm:$0xff] }
   0xa   :  { %88 = vperm.xlu2 %1296, %v1534_v4   ;;  %v48_v20 = vld [vmem:[%s2329_s2 + $0x18] sm:$0xff]  ;;  %v51_v23 = vld [vmem:[%s2329_s2 + $0x30] sm:$0xff]  ;;  %v50_v24 = vld [vmem:[%s2329_s2 + $0x28] sm:$0xff] }
   0xb   :  { %78 = vperm.xlu1 %1295, %v1539_v5   ;;  %68 = vperm.xlu0 %1294, %v1544_v6   ;;  %v52_v22 = vld [vmem:[%s2329_s2 + $0x38] sm:$0xff]  ;;  %v55_v25 = vld [vmem:[%s2329_s2 + $0x50] sm:$0xff]  ;;  %v54_v26 = vld [vmem:[%s2329_s2 + $0x48] sm:$0xff] }
   0xc   :  { %v53_v27 = vld [vmem:[%s2329_s2 + $0x40] sm:$0xff]  ;;  %v58_v28 = vld [vmem:[%s2329_s2 + $0x68] sm:$0xff]  ;;  %v56_v30 = vld [vmem:[%s2329_s2 + $0x58] sm:$0xff] }
   0xd   :  { %v57_v29 = vld [vmem:[%s2329_s2 + $0x60] sm:$0xff]  ;;  %v60_v31 = vld [vmem:[%s2329_s2 + $0x78] sm:$0xff]  ;;  %v59_v32 = vld [vmem:[%s2329_s2 + $0x70] sm:$0xff] }
   0xe   :  { %v1681_v40 = vld [vmem:[%s2327_s0] sm:$0xff]  ;;  %s1469_s0 = smov [#allocation3]  }
   0xf   :  { %v142_v41 = vperm.slane %v1681_v40, 0  ;;  %v143_v42 = vperm.slane %v1681_v40, 4  ;;  %s1222_s19 = sshll.u32 %s1469_s0, 4  ;;  %s1223_s19 = int_to_ptr.vmem [resolvable:$true] %s1222_s19 }
  0x11   :  { %v1690_v46 = vperm.slane %v142_v41, 0  ;;  %v1692_v47 = vperm.slane %v143_v42, 0 }
  0x12   :  { %103 = vperm.xlu2 %1296, %v1552_v7  }
  0x13   :  { %98 = vperm.xlu1 %1295, %v1557_v8   ;;  %93 = vperm.xlu0 %1294, %v1562_v9  }
  0x1a   :  { %118 = vperm.xlu2 %1296, %v1570_v10  }
  0x1b   :  { %113 = vperm.xlu1 %1295, %v1575_v11   ;;  %108 = vperm.xlu0 %1294, %v1580_v12  }
  0x22   :  { %133 = vperm.xlu2 %1296, %v1588_v13  }
  0x23   :  { %128 = vperm.xlu1 %1295, %v1593_v14   ;;  %123 = vperm.xlu0 %1294, %v1598_v15  }
  0x2a   :  { %187 = vperm.xlu2 %1296, %v46_v16  }
  0x2b   :  { %182 = vperm.xlu1 %1295, %v45_v17   ;;  %138 = vperm.xlu0 %1294, %v1612_v18  }
  0x32   :  { %202 = vperm.xlu2 %1296, %v49_v19  }
  0x33   :  { %197 = vperm.xlu1 %1295, %v48_v20   ;;  %192 = vperm.xlu0 %1294, %v47_v21  }
  0x3a   :  { %217 = vperm.xlu2 %1296, %v52_v22  }
  0x3b   :  { %212 = vperm.xlu1 %1295, %v51_v23   ;;  %207 = vperm.xlu0 %1294, %v50_v24  }
  0x42   :  { %232 = vperm.xlu2 %1296, %v55_v25  }
  0x43   :  { %227 = vperm.xlu1 %1295, %v54_v26   ;;  %222 = vperm.xlu0 %1294, %v53_v27  }
  0x4a   :  { %247 = vperm.xlu2 %1296, %v58_v28  }
  0x4b   :  { %242 = vperm.xlu1 %1295, %v57_v29   ;;  %237 = vperm.xlu0 %1294, %v56_v30  }
  0x52   :  { %1297 = vset.pattern.permute.xlu2 %v1466_v33 }
  0x53   :  { %257 = vperm.xlu1 %1295, %v60_v31   ;;  %252 = vperm.xlu0 %1294, %v59_v32  }
  0x54   :  { %293 = vperm.xlu2 %1297, %v1523_v2  }
  0x5b   :  { %1299 = vset.pattern.permute.xlu1 %v1466_v33  ;;  %1298 = vset.pattern.permute.xlu0 %v1466_v33 }
  0x5c   :  { %301 = vperm.xlu1 %1299, %v1518_v1   ;;  %305 = vperm.xlu2 %1297, %v1539_v5   ;;  %v84_v34 = vpop.permute.xlu2 %83 }
  0x5d   :  { %297 = vperm.xlu0 %1298, %v1544_v6   ;;  %v156_v56 = vmul.f32 %v1690_v46, %v84_v34  ;;  %v157_v57 = vmul.f32 %v1692_v47, %v84_v34 }
  0x64   :  { %309 = vperm.xlu1 %1299, %v1513_v0   ;;  %313 = vperm.xlu2 %1297, %v1534_v4   ;;  %v1663_v35 = vpop.permute.xlu2 %88 }
  0x65   :  { %317 = vperm.xlu0 %1298, %v1562_v9  }
  0x6c   :  { %321 = vperm.xlu1 %1299, %v1557_v8   ;;  %325 = vperm.xlu2 %1297, %v1552_v7   ;;  %v1668_v36 = vpop.permute.xlu2 %103 }
  0x6d   :  { %329 = vperm.xlu0 %1298, %v1580_v12  }
  0x74   :  { %333 = vperm.xlu1 %1299, %v1575_v11   ;;  %337 = vperm.xlu2 %1297, %v1570_v10   ;;  %v1673_v37 = vpop.permute.xlu2 %118 }
  0x75   :  { %341 = vperm.xlu0 %1298, %v1598_v15   ;;  %v1676_v38 = vpop.permute.xlu1 %73  ;;  %v64_v39 = vpop.permute.xlu0 %63 }
  0x76   :  { %v148_v25 = vmul.f32 %v1690_v46, %v64_v39  ;;  %v149_v26 = vmul.f32 %v1692_v47, %v64_v39  ;;  %v152_v41 = vmul.f32 %v1690_v46, %v1676_v38 }
  0x7c   :  { %345 = vperm.xlu1 %1299, %v1593_v14   ;;  %349 = vperm.xlu2 %1297, %v1588_v13   ;;  %v1687_v43 = vpop.permute.xlu2 %133 }
  0x7d   :  { %353 = vperm.xlu0 %1298, %v1612_v18   ;;  %v79_v44 = vpop.permute.xlu1 %78  ;;  %v69_v45 = vpop.permute.xlu0 %68 }
  0x7e   :  { %v150_v48 = vmul.f32 %v1690_v46, %v69_v45  ;;  %v151_v49 = vmul.f32 %v1692_v47, %v69_v45  ;;  %v154_v42 = vmul.f32 %v1690_v46, %v79_v44  ;;  %v155_v45 = vmul.f32 %v1692_v47, %v79_v44 }
  0x84   :  { %1300 = vset.pattern.permute.xlu1 %v1467_v50  ;;  %1301 = vset.pattern.permute.xlu2 %v1467_v50  ;;  %v188_v51 = vpop.permute.xlu2 %187 }
  0x85   :  { %1302 = vset.pattern.permute.xlu0 %v1467_v50  ;;  %v1699_v52 = vadd.f32 %v188_v51, %v150_v48  ;;  %v1701_v53 = vadd.f32 %v188_v51, %v151_v49  ;;  %v99_v54 = vpop.permute.xlu1 %98  ;;  %427 = vperm.xlu1 %1300, %v1523_v2   ;;  %v94_v55 = vpop.permute.xlu0 %93  ;;  %v153_v49 = vmul.f32 %v1692_v47, %v1676_v38  ;;  %v356_v38 = vperm.slane %v1681_v40, 1 }
  0x86   :  { %431 = vperm.xlu2 %1301, %v1544_v6   ;;  %435 = vperm.xlu0 %1302, %v1518_v1   ;;  %v162_v63 = vmul.f32 %v1690_v46, %v99_v54  ;;  %v163_v16 = vmul.f32 %v1692_v47, %v99_v54 }
  0x8c   :  { %v203_v58 = vpop.permute.xlu2 %202 }
  0x8d   :  { %v1708_v59 = vadd.f32 %v203_v58, %v156_v56  ;;  %v1710_v60 = vadd.f32 %v203_v58, %v157_v57  ;;  %v114_v61 = vpop.permute.xlu1 %113  ;;  %439 = vperm.xlu1 %1300, %v1539_v5   ;;  %v1713_v62 = vpop.permute.xlu0 %108 }
  0x8e   :  { %443 = vperm.xlu2 %1301, %v1513_v0   ;;  %455 = vperm.xlu0 %1302, %v1557_v8   ;;  %v168_v23 = vmul.f32 %v1690_v46, %v114_v61  ;;  %v169_v24 = vmul.f32 %v1692_v47, %v114_v61 }
  0x94   :  { %v218_v17 = vpop.permute.xlu2 %217 }
  0x95   :  { %v1719_v19 = vadd.f32 %v218_v17, %v162_v63  ;;  %v1721_v20 = vadd.f32 %v218_v17, %v163_v16  ;;  %v129_v21 = vpop.permute.xlu1 %128  ;;  %447 = vperm.xlu1 %1300, %v1534_v4   ;;  %v1724_v22 = vpop.permute.xlu0 %123  ;;  %v357_v16 = vperm.slane %v1681_v40, 5  ;;  %v1762_v17 = vperm.slane %v356_v38, 1 }
  0x96   :  { %451 = vperm.xlu2 %1301, %v1562_v9   ;;  %467 = vperm.xlu0 %1302, %v1575_v11   ;;  %v174_v34 = vmul.f32 %v1690_v46, %v129_v21  ;;  %v175_v39 = vmul.f32 %v1692_v47, %v129_v21  ;;  %v165_v38 = vmul.f32 %v1692_v47, %v1668_v36 }
  0x97   :  { %v1764_v21 = vperm.slane %v357_v16, 1 }
  0x9c   :  { %v233_v27 = vpop.permute.xlu2 %232 }
  0x9d   :  { %v1732_v28 = vadd.f32 %v233_v27, %v168_v23  ;;  %v1734_v29 = vadd.f32 %v233_v27, %v169_v24  ;;  %v183_v30 = vpop.permute.xlu1 %182  ;;  %459 = vperm.xlu1 %1300, %v1552_v7   ;;  %v1737_v31 = vpop.permute.xlu0 %138  ;;  %v158_v23 = vmul.f32 %v1690_v46, %v1663_v35  ;;  %v160_v24 = vmul.f32 %v1690_v46, %v94_v55 }
  0x9e   :  { %v260_v32 = vadd.f32 %v183_v30, %v148_v25  ;;  %v261_v33 = vadd.f32 %v183_v30, %v149_v26  ;;  %463 = vperm.xlu2 %1301, %v1580_v12   ;;  %487 = vperm.xlu0 %1302, %v1612_v18   ;;  %v161_v25 = vmul.f32 %v1692_v47, %v94_v55  ;;  %v1468_v30 = vmov 3  }
  0x9f   :  { %v159_v26 = vmul.f32 %v1692_v47, %v1663_v35 }
  0xa4   :  { %v248_v48 = vpop.permute.xlu2 %247 }
  0xa5   :  { %v1749_v51 = vadd.f32 %v248_v48, %v174_v34  ;;  %v1751_v54 = vadd.f32 %v248_v48, %v175_v39  ;;  %v198_v56 = vpop.permute.xlu1 %197  ;;  %471 = vperm.xlu1 %1300, %v1570_v10   ;;  %v193_v57 = vpop.permute.xlu0 %192 }
  0xa6   :  { %v266_v58 = vadd.f32 %v198_v56, %v154_v42  ;;  %v267_v61 = vadd.f32 %v198_v56, %v155_v45  ;;  %483 = vperm.xlu2 %1301, %v1588_v13   ;;  %475 = vperm.xlu0 %1302, %v1598_v15   ;;  %v1756_v63 = vadd.f32 %v193_v57, %v152_v41 }
  0xa7   :  { %v1758_v44 = vadd.f32 %v193_v57, %v153_v49  ;;  %v164_v57 = vmul.f32 %v1690_v46, %v1668_v36 }
  0xad   :  { %v213_v27 = vpop.permute.xlu1 %212  ;;  %1303 = vset.pattern.permute.xlu1 %v1468_v30  ;;  %v208_v34 = vpop.permute.xlu0 %207 }
  0xae   :  { %v1772_v39 = vadd.f32 %v213_v27, %v160_v24  ;;  %v1774_v41 = vadd.f32 %v213_v27, %v161_v25  ;;  %1304 = vset.pattern.permute.xlu2 %v1468_v30  ;;  %1306 = vset.pattern.permute.xlu0 %v1468_v30  ;;  %v270_v42 = vadd.f32 %v208_v34, %v158_v23  ;;  %v294_v45 = vpop.permute.xlu2 %293 }
  0xaf   :  { %v271_v48 = vadd.f32 %v208_v34, %v159_v26  ;;  %617 = vperm.xlu1 %1303, %v1588_v13   ;;  %621 = vperm.xlu2 %1304, %v1612_v18   ;;  %v362_v55 = vmul.f32 %v1762_v17, %v294_v45  ;;  %v363_v35 = vmul.f32 %v1764_v21, %v294_v45 }
  0xb0   :  { %613 = vperm.xlu0 %1306, %v1593_v14   ;;  %v166_v13 = vmul.f32 %v1690_v46, %v1713_v62  ;;  %v167_v18 = vmul.f32 %v1692_v47, %v1713_v62  ;;  %v170_v45 = vmul.f32 %v1690_v46, %v1673_v37 }
  0xb1   :  { %v1781_v49 = vadd.f32 %v362_v55, %v260_v32  ;;  %v1783_v56 = vadd.f32 %v363_v35, %v261_v33  ;;  %v173_v55 = vmul.f32 %v1692_v47, %v1724_v22 }
  0xb5   :  { %v228_v16 = vpop.permute.xlu1 %227  ;;  %v223_v23 = vpop.permute.xlu0 %222 }
  0xb6   :  { %v1793_v24 = vadd.f32 %v228_v16, %v166_v13  ;;  %v1795_v32 = vadd.f32 %v228_v16, %v167_v18  ;;  %v276_v33 = vadd.f32 %v223_v23, %v164_v57  ;;  %v277_v25 = vadd.f32 %v223_v23, %v165_v38  ;;  %v306_v26 = vpop.permute.xlu2 %305 }
  0xb7   :  { %1305 = vset.pattern.permute.xlu1 %v1467_v50  ;;  %609 = vperm.xlu2 %1304, %v1598_v15   ;;  %v368_v36 = vmul.f32 %v1762_v17, %v306_v26  ;;  %v369_v27 = vmul.f32 %v1764_v21, %v306_v26  ;;  %v171_v50 = vmul.f32 %v1692_v47, %v1673_v37 }
  0xb8   :  { %585 = vperm.xlu0 %1306, %v1562_v9   ;;  %479 = vperm.xlu1 %1305, %v1593_v14   ;;  %v172_v15 = vmul.f32 %v1690_v46, %v1724_v22  ;;  %v176_v16 = vmul.f32 %v1690_v46, %v1687_v43  ;;  %v177_v23 = vmul.f32 %v1692_v47, %v1687_v43 }
  0xb9   :  { %v1803_v62 = vadd.f32 %v368_v36, %v266_v58  ;;  %v1805_v34 = vadd.f32 %v369_v27, %v267_v61  ;;  %v179_v26 = vmul.f32 %v1692_v47, %v1737_v31 }
  0xbd   :  { %v243_v35 = vpop.permute.xlu1 %242  ;;  %v238_v9 = vpop.permute.xlu0 %237 }
  0xbe   :  { %v1815_v57 = vadd.f32 %v243_v35, %v172_v15  ;;  %v1817_v14 = vadd.f32 %v243_v35, %v173_v55  ;;  %v282_v58 = vadd.f32 %v238_v9, %v170_v45  ;;  %v283_v61 = vadd.f32 %v238_v9, %v171_v50  ;;  %v314_v38 = vpop.permute.xlu2 %313 }
  0xbf   :  { %605 = vperm.xlu2 %1304, %v1570_v10   ;;  %v372_v13 = vmul.f32 %v1762_v17, %v314_v38  ;;  %v373_v37 = vmul.f32 %v1764_v21, %v314_v38  ;;  %v178_v10 = vmul.f32 %v1690_v46, %v1737_v31 }
  0xc0   :  { %581 = vperm.xlu0 %1306, %v1534_v4   ;;  %1307 = vset.pattern.permute.xlu1 %v1468_v30 }
  0xc1   :  { %v1823_v18 = vadd.f32 %v372_v13, %v270_v42  ;;  %v1825_v22 = vadd.f32 %v373_v37, %v271_v48  ;;  %601 = vperm.xlu1 %1307, %v1575_v11  }
  0xc5   :  { %v258_v4 = vpop.permute.xlu1 %257  ;;  %v253_v30 = vpop.permute.xlu0 %252 }
  0xc6   :  { %v1836_v42 = vadd.f32 %v258_v4, %v178_v10  ;;  %v1838_v48 = vadd.f32 %v258_v4, %v179_v26  ;;  %v1840_v36 = vadd.f32 %v253_v30, %v176_v16  ;;  %v1842_v11 = vadd.f32 %v253_v30, %v177_v23  ;;  %v326_v27 = vpop.permute.xlu2 %325 }
  0xc7   :  { %597 = vperm.xlu2 %1304, %v1580_v12   ;;  %v378_v43 = vmul.f32 %v1762_v17, %v326_v27  ;;  %v379_v46 = vmul.f32 %v1764_v21, %v326_v27  ;;  %v491_v26 = vperm.slane %v1681_v40, 6 }
  0xc8   :  { %561 = vperm.xlu0 %1306, %v1523_v2  }
  0xc9   :  { %v1848_v47 = vadd.f32 %v378_v43, %v276_v33  ;;  %v1850_v31 = vadd.f32 %v379_v46, %v277_v25  ;;  %593 = vperm.xlu1 %1307, %v1552_v7   ;;  %v1894_v27 = vperm.slane %v491_v26, 2 }
  0xce   :  { %v302_v45 = vpop.permute.xlu1 %301  ;;  %v338_v50 = vpop.permute.xlu2 %337 }
  0xcf   :  { %v366_v15 = vmul.f32 %v1762_v17, %v302_v45  ;;  %v367_v55 = vmul.f32 %v1764_v21, %v302_v45  ;;  %577 = vperm.xlu2 %1304, %v1513_v0   ;;  %v384_v12 = vmul.f32 %v1762_v17, %v338_v50  ;;  %v385_v35 = vmul.f32 %v1764_v21, %v338_v50  ;;  %v298_v9 = vpop.permute.xlu0 %297 }
  0xd0   :  { %v364_v2 = vmul.f32 %v1762_v17, %v298_v9  ;;  %v365_v33 = vmul.f32 %v1764_v21, %v298_v9  ;;  %1309 = vset.pattern.permute.xlu0 %v1465_v3 }
  0xd1   :  { %v1862_v7 = vadd.f32 %v366_v15, %v1756_v63  ;;  %v1865_v25 = vadd.f32 %v367_v55, %v1758_v44  ;;  %v1867_v38 = vadd.f32 %v384_v12, %v282_v58  ;;  %v1869_v0 = vadd.f32 %v385_v35, %v283_v61  ;;  %589 = vperm.xlu1 %1307, %v1557_v8  }
  0xd2   :  { %v396_v13 = vadd.f32 %v364_v2, %v1699_v52  ;;  %v397_v37 = vadd.f32 %v365_v33, %v1701_v53  ;;  %v490_v53 = vperm.slane %v1681_v40, 2 }
  0xd4   :  { %v1892_v30 = vperm.slane %v490_v53, 2 }
  0xd6   :  { %v310_v16 = vpop.permute.xlu1 %309  ;;  %v1874_v23 = vpop.permute.xlu2 %349 }
  0xd7   :  { %v370_v10 = vmul.f32 %v1762_v17, %v310_v16  ;;  %v371_v63 = vmul.f32 %v1764_v21, %v310_v16  ;;  %573 = vperm.xlu2 %1304, %v1539_v5   ;;  %v318_v44 = vpop.permute.xlu0 %317 }
  0xd8   :  { %v374_v58 = vmul.f32 %v1762_v17, %v318_v44  ;;  %v375_v61 = vmul.f32 %v1764_v21, %v318_v44 }
  0xd9   :  { %v402_v8 = vadd.f32 %v370_v10, %v1708_v59  ;;  %v403_v52 = vadd.f32 %v371_v63, %v1710_v60  ;;  %569 = vperm.xlu1 %1307, %v1518_v1  }
  0xda   :  { %v1887_v4 = vadd.f32 %v374_v58, %v1772_v39  ;;  %v1890_v5 = vadd.f32 %v375_v61, %v1774_v41 }
  0xde   :  { %v322_v43 = vpop.permute.xlu1 %321 }
  0xdf   :  { %v376_v59 = vmul.f32 %v1762_v17, %v322_v43  ;;  %v377_v60 = vmul.f32 %v1764_v21, %v322_v43  ;;  %v330_v1 = vpop.permute.xlu0 %329  ;;  %1308 = vset.pattern.permute.xlu2 %v1465_v3 }
  0xe0   :  { %v380_v46 = vmul.f32 %v1762_v17, %v330_v1  ;;  %v381_v39 = vmul.f32 %v1764_v21, %v330_v1  ;;  %v432_v45 = vpop.permute.xlu2 %431 }
  0xe1   :  { %v1902_v41 = vadd.f32 %v376_v59, %v1719_v19  ;;  %v1905_v50 = vadd.f32 %v377_v60, %v1721_v20  ;;  %v498_v15 = vmul.f32 %v1892_v30, %v432_v45  ;;  %v499_v55 = vmul.f32 %v1894_v27, %v432_v45  ;;  %565 = vperm.xlu1 %1307, %v1544_v6  }
  0xe2   :  { %v1911_v12 = vadd.f32 %v380_v46, %v1793_v24  ;;  %v1914_v35 = vadd.f32 %v381_v39, %v1795_v32 }
  0xe3   :  { %v1916_v9 = vadd.f32 %v498_v15, %v396_v13  ;;  %v1918_v2 = vadd.f32 %v499_v55, %v397_v37 }
  0xe5   :  { %2335 = vst [vmem:[#allocation6_spill] sm:$0xff] %v1916_v9 }
  0xe6   :  { %2336 = vst [vmem:[#allocation7_spill] sm:$0xff] %v1918_v2  ;;  %v334_v19 = vpop.permute.xlu1 %333 }
  0xe7   :  { %v382_v20 = vmul.f32 %v1762_v17, %v334_v19  ;;  %v383_v33 = vmul.f32 %v1764_v21, %v334_v19  ;;  %v1922_v16 = vpop.permute.xlu0 %341 }
  0xe8   :  { %v444_v10 = vpop.permute.xlu2 %443 }
  0xe9   :  { %v1925_v6 = vadd.f32 %v382_v20, %v1732_v28  ;;  %v1928_v24 = vadd.f32 %v383_v33, %v1734_v29  ;;  %v504_v32 = vmul.f32 %v1892_v30, %v444_v10  ;;  %v505_v13 = vmul.f32 %v1894_v27, %v444_v10  ;;  %1310 = vset.pattern.permute.xlu1 %v1465_v3  ;;  %v762_v33 = vld [vmem:[%s2331_s4 + $0x20] sm:$0xff] }
  0xeb   :  { %v1933_v37 = vadd.f32 %v504_v32, %v402_v8  ;;  %v1935_v63 = vadd.f32 %v505_v13, %v403_v52  ;;  %v765_v13 = vld [vmem:[%s2331_s4 + $0x38] sm:$0xff] }
  0xee   :  { %v1937_v44 = vpop.permute.xlu1 %345 }
  0xef   :  { %v354_v58 = vpop.permute.xlu0 %353 }
  0xf0   :  { %v1939_v61 = vpop.permute.xlu2 %451 }
  0xf7   :  { %v428_v28 = vpop.permute.xlu1 %427 }
  0xf8   :  { %v496_v53 = vmul.f32 %v1892_v30, %v428_v28  ;;  %v497_v29 = vmul.f32 %v1894_v27, %v428_v28  ;;  %v1943_v26 = vpop.permute.xlu2 %463  ;;  %v436_v43 = vpop.permute.xlu0 %435  ;;  %v624_v28 = vperm.slane %v1681_v40, 3 }
  0xf9   :  { %v500_v59 = vmul.f32 %v1892_v30, %v436_v43  ;;  %v501_v3 = vmul.f32 %v1894_v27, %v436_v43  ;;  %v758_v43 = vld [vmem:[%s2331_s4] sm:$0xff] }
  0xfa   :  { %v1948_v8 = vadd.f32 %v496_v53, %v1781_v49  ;;  %v1951_v52 = vadd.f32 %v497_v29, %v1783_v56  ;;  %v760_v49 = vld [vmem:[%s2331_s4 + $0x10] sm:$0xff]  ;;  %v625_v53 = vperm.slane %v1681_v40, 7  ;;  %v392_v29 = vmul.f32 %v1762_v17, %v354_v58  ;;  %776 = vperm.xlu2 %1308, %v758_v43  }
  0xfb   :  { %v1954_v60 = vadd.f32 %v500_v59, %v1862_v7  ;;  %v1957_v1 = vadd.f32 %v501_v3, %v1865_v25  ;;  %786 = vperm.xlu1 %1310, %v760_v49   ;;  %v393_v59 = vmul.f32 %v1764_v21, %v354_v58  ;;  %v764_v49 = vld [vmem:[%s2331_s4 + $0x30] sm:$0xff]  ;;  %v390_v43 = vmul.f32 %v1762_v17, %v1874_v23 }
  0xfc   :  { %2337 = vst [vmem:[#allocation8_spill] sm:$0xff] %v1951_v52  ;;  %v2002_v40 = vperm.slane %v625_v53, 3  ;;  %v424_v58 = vadd.f32 %v392_v29, %v1836_v42  ;;  %v391_v53 = vmul.f32 %v1764_v21, %v1874_v23 }
  0xff   :  { %v440_v46 = vpop.permute.xlu1 %439 }
 0x100   :  { %v502_v39 = vmul.f32 %v1892_v30, %v440_v46  ;;  %v503_v45 = vmul.f32 %v1894_v27, %v440_v46  ;;  %v484_v15 = vpop.permute.xlu2 %483  ;;  %v1961_v55 = vpop.permute.xlu0 %455  ;;  %v1996_v46 = vperm.slane %v624_v28, 3  ;;  %v425_v28 = vadd.f32 %v393_v59, %v1838_v48  ;;  %v761_v48 = vld [vmem:[%s2331_s4 + $0x18] sm:$0xff] }
 0x101   :  { %v524_v42 = vmul.f32 %v1892_v30, %v484_v15  ;;  %v525_v29 = vmul.f32 %v1894_v27, %v484_v15  ;;  %v422_v59 = vadd.f32 %v390_v43, %v1840_v36  ;;  %v387_v43 = vmul.f32 %v1764_v21, %v1922_v16 }
 0x102   :  { %v1967_v56 = vadd.f32 %v502_v39, %v1803_v62  ;;  %v1970_v7 = vadd.f32 %v503_v45, %v1805_v34  ;;  %v759_v62 = vld [vmem:[%s2331_s4 + $0x8] sm:$0xff]  ;;  %791 = vperm.xlu2 %1308, %v761_v48  }
 0x103   :  { %796 = vperm.xlu1 %1310, %v762_v33   ;;  %781 = vperm.xlu0 %1309, %v759_v62  }
 0x107   :  { %v1972_v25 = vpop.permute.xlu1 %447 }
 0x108   :  { %v1974_v19 = vpop.permute.xlu0 %467 }
 0x109   :  { %v622_v20 = vpop.permute.xlu2 %621 }
 0x10b   :  { %811 = vperm.xlu1 %1310, %v765_v13   ;;  %806 = vperm.xlu0 %1309, %v764_v49   ;;  %v768_v13 = vld [vmem:[%s2331_s4 + $0x50] sm:$0xff]  ;;  %v661_v49 = vmul.f32 %v2002_v40, %v622_v20 }
 0x10f   :  { %v1979_v10 = vpop.permute.xlu1 %459 }
 0x110   :  { %v488_v32 = vpop.permute.xlu0 %487 }
 0x111   :  { %v1984_v34 = vpop.permute.xlu2 %609  ;;  %v526_v39 = vmul.f32 %v1892_v30, %v488_v32  ;;  %v527_v33 = vmul.f32 %v1894_v27, %v488_v32  ;;  %v660_v32 = vmul.f32 %v1996_v46, %v622_v20  ;;  %v386_v20 = vmul.f32 %v1762_v17, %v1922_v16  ;;  %v763_v16 = vld [vmem:[%s2331_s4 + $0x28] sm:$0xff] }
 0x112   :  { %801 = vperm.xlu2 %1308, %v763_v16  }
 0x113   :  { %826 = vperm.xlu1 %1310, %v768_v13   ;;  %v558_v2 = vadd.f32 %v526_v39, %v424_v58  ;;  %v559_v9 = vadd.f32 %v527_v33, %v425_v28  ;;  %v423_v13 = vadd.f32 %v391_v53, %v1842_v11  ;;  %v767_v39 = vld [vmem:[%s2331_s4 + $0x48] sm:$0xff]  ;;  %v556_v28 = vadd.f32 %v524_v42, %v422_v59 }
 0x114   :  { %821 = vperm.xlu0 %1309, %v767_v39   ;;  %v418_v42 = vadd.f32 %v386_v20, %v1815_v57  ;;  %v389_v59 = vmul.f32 %v1764_v21, %v1937_v44  ;;  %v770_v21 = vld [vmem:[%s2331_s4 + $0x60] sm:$0xff] }
 0x115   :  { %v692_v23 = vadd.f32 %v660_v32, %v558_v2  ;;  %v693_v33 = vadd.f32 %v661_v49, %v559_v9  ;;  %v557_v52 = vadd.f32 %v525_v29, %v423_v13  ;;  %v771_v2 = vld [vmem:[%s2331_s4 + $0x68] sm:$0xff]  ;;  %v388_v29 = vmul.f32 %v1762_v17, %v1937_v44 }
 0x116   :  { %v419_v13 = vadd.f32 %v387_v43, %v1817_v14  ;;  %v655_v44 = vmul.f32 %v2002_v40, %v1984_v34  ;;  %v1032_v14 = vld [vmem:[%s2332_s5] sm:$0xff] }
 0x117   :  { %v472_v3 = vpop.permute.xlu1 %471  ;;  %1311 = vtanh.f32 %v692_v23  ;;  %v420_v20 = vadd.f32 %v388_v29, %v1749_v51 }
 0x118   :  { %v476_v45 = vpop.permute.xlu0 %475  ;;  %1313 = vtanh.f32 %v693_v33  ;;  %v518_v57 = vmul.f32 %v1892_v30, %v472_v3  ;;  %v421_v33 = vadd.f32 %v389_v59, %v1751_v54 }
 0x119   :  { %v2005_v62 = vpop.permute.xlu2 %605  ;;  %v520_v9 = vmul.f32 %v1892_v30, %v476_v45  ;;  %v521_v49 = vmul.f32 %v1894_v27, %v476_v45  ;;  %v519_v45 = vmul.f32 %v1894_v27, %v472_v3  ;;  %v506_v3 = vmul.f32 %v1892_v30, %v1972_v25 }
 0x11a   :  { %v550_v54 = vadd.f32 %v518_v57, %v1867_v38 }
 0x11b   :  { %841 = vperm.xlu1 %1310, %v771_v2   ;;  %v552_v17 = vadd.f32 %v520_v9, %v418_v42  ;;  %v553_v23 = vadd.f32 %v521_v49, %v419_v13  ;;  %v652_v49 = vmul.f32 %v1996_v46, %v2005_v62  ;;  %v507_v13 = vmul.f32 %v1894_v27, %v1972_v25  ;;  %v773_v25 = vld [vmem:[%s2331_s4 + $0x78] sm:$0xff] }
 0x11c   :  { %836 = vperm.xlu0 %1309, %v770_v21  }
 0x11d   :  { %v1312_v39 = vpop.eup %1311  ;;  %v687_v29 = vadd.f32 %v655_v44, %v553_v23  ;;  %v514_v44 = vmul.f32 %v1892_v30, %v1943_v26  ;;  %v517_v23 = vmul.f32 %v1894_v27, %v1974_v19 }
 0x121   :  { %v618_v58 = vpop.permute.xlu1 %617  ;;  %v2030_v15 = vpop.permute.xlu2 %597 }
 0x122   :  { %v658_v48 = vmul.f32 %v1996_v46, %v618_v58  ;;  %v659_v36 = vmul.f32 %v2002_v40, %v618_v58  ;;  %v614_v11 = vpop.permute.xlu0 %613 }
 0x123   :  { %1050 = vperm.xlu1 %1310, %v1032_v14  }
 0x124   :  { %v690_v53 = vadd.f32 %v658_v48, %v556_v28  ;;  %v691_v32 = vadd.f32 %v659_v36, %v557_v52  ;;  %v654_v52 = vmul.f32 %v1996_v46, %v1984_v34  ;;  %v1314_v48 = vpop.eup %1313  ;;  %v656_v34 = vmul.f32 %v1996_v46, %v614_v11  ;;  %851 = vperm.xlu0 %1309, %v773_v25  }
 0x125   :  { %v657_v36 = vmul.f32 %v2002_v40, %v614_v11  ;;  %v653_v11 = vmul.f32 %v2002_v40, %v2005_v62  ;;  %v516_v62 = vmul.f32 %v1892_v30, %v1974_v19 }
 0x126   :  { %1315 = vtanh.f32 %v690_v53  ;;  %v551_v53 = vadd.f32 %v519_v45, %v1869_v0  ;;  %v766_v0 = vld [vmem:[%s2331_s4 + $0x40] sm:$0xff] }
 0x127   :  { %1317 = vtanh.f32 %v691_v32  ;;  %v686_v32 = vadd.f32 %v654_v52, %v552_v17  ;;  %816 = vperm.xlu2 %1308, %v766_v0   ;;  %v684_v17 = vadd.f32 %v652_v49, %v550_v54  ;;  %v515_v54 = vmul.f32 %v1894_v27, %v1943_v26 }
 0x129   :  { %v578_v2 = vpop.permute.xlu2 %577  ;;  %1319 = vtanh.f32 %v686_v32 }
 0x12a   :  { %v2066_v58 = vpop.permute.xlu0 %585  ;;  %v480_v28 = vpop.permute.xlu1 %479  ;;  %v638_v21 = vmul.f32 %v1996_v46, %v578_v2  ;;  %v639_v52 = vmul.f32 %v2002_v40, %v578_v2  ;;  %1321 = vtanh.f32 %v687_v29 }
 0x12b   :  { %v522_v43 = vmul.f32 %v1892_v30, %v480_v28  ;;  %v523_v9 = vmul.f32 %v1894_v27, %v480_v28  ;;  %v539_v28 = vadd.f32 %v507_v13, %v1825_v22  ;;  %v546_v13 = vadd.f32 %v514_v44, %v1911_v12 }
 0x12c   :  { %v1316_v51 = vpop.eup %1315 }
 0x12d   :  { %v1318_v42 = vpop.eup %1317  ;;  %v554_v59 = vadd.f32 %v522_v43, %v420_v20  ;;  %v555_v16 = vadd.f32 %v523_v9, %v421_v33  ;;  %v756_v14 = vpack.c.bf16 %v1312_v39, %v1316_v51  ;;  %v685_v39 = vadd.f32 %v653_v11, %v551_v53  ;;  %v1035_v20 = vld [vmem:[%s2332_s5 + $0x18] sm:$0xff] }
 0x12e   :  { %v757_v38 = vpack.c.bf16 %v1314_v48, %v1318_v42  ;;  %v538_v33 = vadd.f32 %v506_v3, %v1823_v18  ;;  %v670_v48 = vadd.f32 %v638_v21, %v1933_v37  ;;  %1065 = vperm.xlu1 %1310, %v1035_v20   ;;  %v548_v9 = vadd.f32 %v516_v62, %v1925_v6  ;;  %v769_v6 = vld [vmem:[%s2331_s4 + $0x58] sm:$0xff] }
 0x12f   :  { %v688_v57 = vadd.f32 %v656_v34, %v554_v59  ;;  %v689_v45 = vadd.f32 %v657_v36, %v555_v16  ;;  %902 = vmatpush.bf16.msra.mxu0 %v756_v14  ;;  %1273 = vmatpush.bf16.msra.mxu2 %v756_v14  ;;  %v671_v36 = vadd.f32 %v639_v52, %v1935_v63  ;;  %v1320_v63 = vpop.eup %1319  ;;  %v1034_v59 = vld [vmem:[%s2332_s5 + $0x10] sm:$0xff] }
 0x130   :  { %951 = vmatpush.bf16.msra.mxu1 %v757_v38  ;;  %1281 = vmatpush.bf16.msra.mxu3 %v757_v38  ;;  %v549_v37 = vadd.f32 %v517_v23, %v1928_v24  ;;  %v512_v53 = vmul.f32 %v1892_v30, %v1979_v10  ;;  %v1322_v49 = vpop.eup %1321  ;;  %v513_v24 = vmul.f32 %v1894_v27, %v1979_v10  ;;  %v772_v23 = vld [vmem:[%s2331_s4 + $0x70] sm:$0xff] }
 0x131   :  { %1323 = vtanh.f32 %v688_v57  ;;  %v648_v42 = vmul.f32 %v1996_v46, %v2030_v15  ;;  %831 = vperm.xlu2 %1308, %v769_v6   ;;  %v649_v11 = vmul.f32 %v2002_v40, %v2030_v15  ;;  %v508_v14 = vmul.f32 %v1892_v30, %v1939_v61  ;;  %1060 = vperm.xlu0 %1309, %v1034_v59   ;;  %v1038_v15 = vld [vmem:[%s2332_s5 + $0x30] sm:$0xff] }
 0x132   :  { %v582_v34 = vpop.permute.xlu0 %581  ;;  %1325 = vtanh.f32 %v689_v45  ;;  %v547_v38 = vadd.f32 %v515_v54, %v1914_v35  ;;  %v544_v57 = vadd.f32 %v512_v53, %v1848_v47  ;;  %v545_v12 = vadd.f32 %v513_v24, %v1850_v31 }
 0x133   :  { %v640_v19 = vmul.f32 %v1996_v46, %v582_v34  ;;  %v641_v2 = vmul.f32 %v2002_v40, %v582_v34  ;;  %v602_v43 = vpop.permute.xlu1 %601  ;;  %1327 = vtanh.f32 %v684_v17  ;;  %v680_v45 = vadd.f32 %v648_v42, %v546_v13 }
 0x134   :  { %v650_v18 = vmul.f32 %v1996_v46, %v602_v43  ;;  %v651_v22 = vmul.f32 %v2002_v40, %v602_v43  ;;  %1329 = vtanh.f32 %v685_v39  ;;  %v681_v25 = vadd.f32 %v649_v11, %v547_v38 }
 0x135   :  { %v672_v3 = vadd.f32 %v640_v19, %v538_v33  ;;  %v673_v51 = vadd.f32 %v641_v2, %v539_v28  ;;  %1331 = vtanh.f32 %v670_v48  ;;  %v509_v31 = vmul.f32 %v1894_v27, %v1939_v61  ;;  %v1037_v61 = vld [vmem:[%s2332_s5 + $0x28] sm:$0xff] }
 0x136   :  { %v682_v32 = vadd.f32 %v650_v18, %v548_v9  ;;  %1333 = vtanh.f32 %v671_v36  ;;  %v683_v29 = vadd.f32 %v651_v22, %v549_v37  ;;  %1080 = vperm.xlu1 %1310, %v1038_v15   ;;  %v642_v20 = vmul.f32 %v1996_v46, %v2066_v58 }
 0x137   :  { %v1324_v26 = vpop.eup %1323  ;;  %1335 = vtanh.f32 %v672_v3  ;;  %v510_v34 = vmul.f32 %v1892_v30, %v1961_v55  ;;  %v643_v36 = vmul.f32 %v2002_v40, %v2066_v58  ;;  %v540_v43 = vadd.f32 %v508_v14, %v1887_v4 }
 0x138   :  { %v1326_v16 = vpop.eup %1325  ;;  %1337 = vtanh.f32 %v673_v51  ;;  %v754_v10 = vpack.c.bf16 %v1324_v26, %v1320_v63  ;;  %v511_v9 = vmul.f32 %v1894_v27, %v1961_v55  ;;  %v541_v22 = vadd.f32 %v509_v31, %v1890_v5  ;;  %v1041_v51 = vld [vmem:[%s2332_s5 + $0x48] sm:$0xff]  ;;  %v574_v27 = vpop.permute.xlu2 %573 }
 0x139   :  { %v1328_v21 = vpop.eup %1327  ;;  %1339 = vtanh.f32 %v682_v32  ;;  %v755_v0 = vpack.c.bf16 %v1326_v16, %v1322_v49  ;;  %846 = vperm.xlu2 %1308, %v772_v23   ;;  %v674_v37 = vadd.f32 %v642_v20, %v540_v43  ;;  %1075 = vperm.xlu0 %1309, %v1037_v61   ;;  %v542_v4 = vadd.f32 %v510_v34, %v1902_v41  ;;  %v1033_v32 = vld [vmem:[%s2332_s5 + $0x8] sm:$0xff]  ;;  %v1040_v16 = vld [vmem:[%s2332_s5 + $0x40] sm:$0xff]  ;;  %v1043_v23 = vld [vmem:[%s2332_s5 + $0x58] sm:$0xff] }
 0x13a   :  { %v1330_v52 = vpop.eup %1329  ;;  %1341 = vtanh.f32 %v683_v29  ;;  %903 = vmatpush.bf16.msra.mxu0 %v754_v10  ;;  %1274 = vmatpush.bf16.msra.mxu2 %v754_v10  ;;  %v675_v63 = vadd.f32 %v643_v36, %v541_v22  ;;  %v543_v54 = vadd.f32 %v511_v9, %v1905_v50  ;;  %v636_v49 = vmul.f32 %v1996_v46, %v574_v27  ;;  %v1044_v10 = vld [vmem:[%s2332_s5 + $0x60] sm:$0xff]  ;;  %v562_v14 = vpop.permute.xlu0 %561  ;;  %v2340_v61 = vld [vmem:[#allocation7_spill] sm:$0xff] }
 0x13b   :  { %v594_v62 = vpop.permute.xlu1 %593  ;;  %v1332_v17 = vpop.eup %1331  ;;  %952 = vmatpush.bf16.msra.mxu1 %v755_v0  ;;  %1282 = vmatpush.bf16.msra.mxu3 %v755_v0  ;;  %1343 = vtanh.f32 %v680_v45  ;;  %v637_v50 = vmul.f32 %v2002_v40, %v574_v27  ;;  %v2339_v36 = vld [vmem:[#allocation6_spill] sm:$0xff] }
 0x13c   :  { %v646_v35 = vmul.f32 %v1996_v46, %v594_v62  ;;  %v647_v44 = vmul.f32 %v2002_v40, %v594_v62  ;;  %v1334_v47 = vpop.eup %1333  ;;  %1345 = vtanh.f32 %v681_v25  ;;  %v668_v13 = vadd.f32 %v636_v49, %v1967_v56  ;;  %v1036_v56 = vld [vmem:[%s2332_s5 + $0x20] sm:$0xff]  ;;  %v1045_v27 = vld [vmem:[%s2332_s5 + $0x68] sm:$0xff] }
 0x13d   :  { %v1336_v39 = vpop.eup %1335  ;;  %v631_v25 = vmul.f32 %v2002_v40, %v562_v14 }
 0x13e   :  { %v678_v33 = vadd.f32 %v646_v35, %v544_v57  ;;  %v679_v28 = vadd.f32 %v647_v44, %v545_v12  ;;  %v1338_v48 = vpop.eup %1337  ;;  %v2145_v19 = vpack.c.bf16 %v1336_v39, %v1332_v17  ;;  %1095 = vperm.xlu1 %1310, %v1041_v51  }
 0x13f   :  { %v1340_v2 = vpop.eup %1339  ;;  %v2153_v18 = vpack.c.bf16 %v1338_v48, %v1334_v47  ;;  %v1039_v48 = vld [vmem:[%s2332_s5 + $0x38] sm:$0xff] }
 0x140   :  { %v1342_v30 = vpop.eup %1341  ;;  %1347 = vtanh.f32 %v678_v33  ;;  %v752_v58 = vpack.c.bf16 %v1328_v21, %v1340_v2  ;;  %v669_v21 = vadd.f32 %v637_v50, %v1970_v7  ;;  %v630_v7 = vmul.f32 %v1996_v46, %v562_v14 }
 0x141   :  { %1349 = vtanh.f32 %v679_v28  ;;  %v753_v3 = vpack.c.bf16 %v1330_v52, %v1342_v30  ;;  %v1344_v6 = vpop.eup %1343  ;;  %1055 = vperm.xlu2 %1308, %v1033_v32   ;;  %1090 = vperm.xlu0 %1309, %v1040_v16   ;;  %v1047_v28 = vld [vmem:[%s2332_s5 + $0x78] sm:$0xff] }
 0x142   :  { %904 = vmatpush.bf16.msra.mxu0 %v752_v58  ;;  %1275 = vmatpush.bf16.msra.mxu2 %v752_v58  ;;  %v1346_v41 = vpop.eup %1345  ;;  %1351 = vtanh.f32 %v674_v37  ;;  %v662_v47 = vadd.f32 %v630_v7, %v1948_v8  ;;  %v1268_v32 = vld [vmem:[%s2330_s3 + $0x18] sm:$0xff] }
 0x143   :  { %v590_v55 = vpop.permute.xlu1 %589  ;;  %953 = vmatpush.bf16.msra.mxu1 %v753_v3  ;;  %1283 = vmatpush.bf16.msra.mxu3 %v753_v3  ;;  %1353 = vtanh.f32 %v675_v63  ;;  %v1269_v63 = vld [vmem:[%s2330_s3 + $0x20] sm:$0xff] }
 0x144   :  { %v644_v5 = vmul.f32 %v1996_v46, %v590_v55  ;;  %v645_v53 = vmul.f32 %v2002_v40, %v590_v55  ;;  %v1266_v55 = vld [vmem:[%s2330_s3 + $0x8] sm:$0xff] }
 0x146   :  { %v676_v24 = vadd.f32 %v644_v5, %v542_v4  ;;  %v677_v42 = vadd.f32 %v645_v53, %v543_v54  ;;  %v1348_v29 = vpop.eup %1347  ;;  %1110 = vperm.xlu1 %1310, %v1044_v10   ;;  %v1265_v4 = vld [vmem:[%s2330_s3] sm:$0xff]  ;;  %v1270_v54 = vld [vmem:[%s2330_s3 + $0x28] sm:$0xff]  ;;  %v1267_v5 = vld [vmem:[%s2330_s3 + $0x10] sm:$0xff] }
 0x147   :  { %v1350_v26 = vpop.eup %1349  ;;  %v750_v11 = vpack.c.bf16 %v1344_v6, %v1348_v29  ;;  %v1271_v53 = vld [vmem:[%s2330_s3 + $0x30] sm:$0xff]  ;;  %v1272_v6 = vld [vmem:[%s2330_s3 + $0x38] sm:$0xff] }
 0x148   :  { %1355 = vtanh.f32 %v676_v24  ;;  %v751_v59 = vpack.c.bf16 %v1346_v41, %v1350_v26  ;;  %v1352_v0 = vpop.eup %1351 }
 0x149   :  { %1357 = vtanh.f32 %v677_v42  ;;  %905 = vmatpush.bf16.msra.mxu0 %v750_v11  ;;  %1276 = vmatpush.bf16.msra.mxu2 %v750_v11  ;;  %v1354_v57 = vpop.eup %1353 }
 0x14a   :  { %954 = vmatpush.bf16.msra.mxu1 %v751_v59  ;;  %1284 = vmatpush.bf16.msra.mxu3 %v751_v59  ;;  %1359 = vtanh.f32 %v668_v13 }
 0x14b   :  { %v570_v38 = vpop.permute.xlu1 %569  ;;  %1361 = vtanh.f32 %v669_v21  ;;  %1070 = vperm.xlu2 %1308, %v1036_v56   ;;  %1105 = vperm.xlu0 %1309, %v1043_v23  }
 0x14c   :  { %v634_v15 = vmul.f32 %v1996_v46, %v570_v38  ;;  %v635_v52 = vmul.f32 %v2002_v40, %v570_v38 }
 0x14e   :  { %v1356_v12 = vpop.eup %1355  ;;  %v666_v45 = vadd.f32 %v634_v15, %v1954_v60  ;;  %v667_v62 = vadd.f32 %v635_v52, %v1957_v1  ;;  %v2338_v60 = vld [vmem:[#allocation8_spill] sm:$0xff]  ;;  %1125 = vperm.xlu1 %1310, %v1047_v28  }
 0x14f   :  { %v1358_v17 = vpop.eup %1357  ;;  %v748_v35 = vpack.c.bf16 %v1356_v12, %v1352_v0  ;;  %v663_v1 = vadd.f32 %v631_v25, %v2338_v60 }
 0x150   :  { %1363 = vtanh.f32 %v666_v45  ;;  %v749_v44 = vpack.c.bf16 %v1358_v17, %v1354_v57  ;;  %v1360_v39 = vpop.eup %1359 }
 0x151   :  { %1365 = vtanh.f32 %v667_v62  ;;  %906 = vmatpush.bf16.msra.mxu0 %v748_v35  ;;  %1277 = vmatpush.bf16.msra.mxu2 %v748_v35  ;;  %v1362_v8 = vpop.eup %1361 }
 0x152   :  { %955 = vmatpush.bf16.msra.mxu1 %v749_v44  ;;  %1285 = vmatpush.bf16.msra.mxu3 %v749_v44  ;;  %1367 = vtanh.f32 %v662_v47 }
 0x153   :  { %v566_v31 = vpop.permute.xlu1 %565  ;;  %1369 = vtanh.f32 %v663_v1  ;;  %1085 = vperm.xlu2 %1308, %v1039_v48  }
 0x154   :  { %v632_v20 = vmul.f32 %v1996_v46, %v566_v31  ;;  %v633_v33 = vmul.f32 %v2002_v40, %v566_v31  ;;  %v777_v41 = vpop.permute.xlu2 %776 }
 0x155   :  { %907 = vmatpush.bf16.msra.mxu0 %v2145_v19  ;;  %1278 = vmatpush.bf16.msra.mxu2 %v2145_v19  ;;  %v1046_v19 = vld [vmem:[%s2332_s5 + $0x70] sm:$0xff] }
 0x156   :  { %v1364_v34 = vpop.eup %1363  ;;  %v664_v46 = vadd.f32 %v632_v20, %v2339_v36  ;;  %v665_v40 = vadd.f32 %v633_v33, %v2340_v61  ;;  %956 = vmatpush.bf16.msra.mxu1 %v2153_v18  ;;  %1286 = vmatpush.bf16.msra.mxu3 %v2153_v18  ;;  %v1042_v18 = vld [vmem:[%s2332_s5 + $0x50] sm:$0xff] }
 0x157   :  { %v1366_v2 = vpop.eup %1365  ;;  %v744_v43 = vpack.c.bf16 %v1360_v39, %v1364_v34  ;;  %1120 = vperm.xlu0 %1309, %v1046_v19  }
 0x158   :  { %1371 = vtanh.f32 %v664_v46  ;;  %v745_v9 = vpack.c.bf16 %v1362_v8, %v1366_v2  ;;  %v1368_v30 = vpop.eup %1367 }
 0x159   :  { %1373 = vtanh.f32 %v665_v40  ;;  %908 = vmatpush.bf16.msra.mxu0 %v744_v43  ;;  %1279 = vmatpush.bf16.msra.mxu2 %v744_v43  ;;  %v1370_v22 = vpop.eup %1369 }
 0x15a   :  { %957 = vmatpush.bf16.msra.mxu1 %v745_v9  ;;  %1287 = vmatpush.bf16.msra.mxu3 %v745_v9 }
 0x15b   :  { %1100 = vperm.xlu2 %1308, %v1042_v18  }
 0x15c   :  { %v792_v24 = vpop.permute.xlu2 %791 }
 0x15e   :  { %v1372_v58 = vpop.eup %1371 }
 0x15f   :  { %v1374_v37 = vpop.eup %1373  ;;  %v742_v3 = vpack.c.bf16 %v1372_v58, %v1368_v30 }
 0x160   :  { %v743_v51 = vpack.c.bf16 %v1374_v37, %v1370_v22 }
 0x161   :  { %909 = vmatpush.bf16.msra.mxu0 %v742_v3  ;;  %1280 = vmatpush.bf16.msra.mxu2 %v742_v3 }
 0x162   :  { %958 = vmatpush.bf16.msra.mxu1 %v743_v51  ;;  %1288 = vmatpush.bf16.msra.mxu3 %v743_v51 }
 0x163   :  { %1115 = vperm.xlu2 %1308, %v1045_v27  }
 0x164   :  { %910 = vmatmul.bf16.vlgmr.msra.gmra.mxu0 %v1265_v4  ;;  %930 = vmatmul.bf16.vlgmr.msra.gmra.mxu2 %v1269_v63 }
 0x165   :  { %959 = vmatmul.bf16.vlgmr.msra.gmra.mxu1 %v1265_v4  ;;  %979 = vmatmul.bf16.vlgmr.msra.gmra.mxu3 %v1269_v63 }
 0x16c   :  { %v802_v50 = vpop.permute.xlu2 %801 }
 0x16d   :  { %v787_v49 = vpop.permute.xlu1 %786 }
 0x174   :  { %915 = vmatmul.bf16.gmra.mxu0 %v1266_v55  ;;  %935 = vmatmul.bf16.gmra.mxu2 %v1270_v54 }
 0x175   :  { %964 = vmatmul.bf16.gmra.mxu1 %v1266_v55  ;;  %984 = vmatmul.bf16.gmra.mxu3 %v1270_v54  ;;  %v782_v42 = vpop.permute.xlu0 %781  ;;  %v797_v29 = vpop.permute.xlu1 %796 }
 0x17d   :  { %v2237_v26 = vpop.permute.xlu0 %806  ;;  %v2239_v59 = vpop.permute.xlu1 %811 }
 0x181   :  { %v2241_v13 = vpop.permute.xlu2 %816 }
 0x184   :  { %920 = vmatmul.bf16.gmra.mxu0 %v1267_v5  ;;  %940 = vmatmul.bf16.gmra.mxu2 %v1271_v53 }
 0x185   :  { %969 = vmatmul.bf16.gmra.mxu1 %v1267_v5  ;;  %989 = vmatmul.bf16.gmra.mxu3 %v1271_v53  ;;  %v2249_v15 = vpop.permute.xlu1 %826 }
 0x186   :  { %v2247_v38 = vpop.permute.xlu0 %821 }
 0x18b   :  { %v2253_v56 = vpop.permute.xlu2 %831 }
 0x18d   :  { %v2259_v62 = vpop.permute.xlu1 %841 }
 0x18e   :  { %v2257_v45 = vpop.permute.xlu0 %836 }
 0x193   :  { %v2265_v44 = vpop.permute.xlu2 %846 }
 0x194   :  { %925 = vmatmul.bf16.gmra.mxu0 %v1268_v32  ;;  %945 = vmatmul.bf16.gmra.mxu2 %v1272_v6 }
 0x195   :  { %974 = vmatmul.bf16.gmra.mxu1 %v1268_v32  ;;  %994 = vmatmul.bf16.gmra.mxu3 %v1272_v6  ;;  %v1051_v1 = vpop.permute.xlu1 %1050 }
 0x196   :  { %v2267_v47 = vpop.permute.xlu0 %851 }
 0x19b   :  { %v1056_v33 = vpop.permute.xlu2 %1055 }
 0x1a0   :  { %v1066_v2 = vpop.permute.xlu1 %1065 }
 0x1a3   :  { %v1061_v34 = vpop.permute.xlu0 %1060 }
 0x1a5   :  { %v2277_v22 = vpop.permute.xlu2 %1070 }
 0x1ab   :  { %v1076_v53 = vpop.permute.xlu0 %1075 }
 0x1e1   :  { %v911_v11 = vpop.f32.mrf.mxu0 }
 0x1e2   :  { %v960_v16 = vpop.f32.mrf.mxu1  ;;  %v912_v28 = vadd.f32 %v911_v11, %v777_v41 }
 0x1e3   :  { %v961_v48 = vadd.f32 %v960_v16, %v777_v41 }
 0x1e4   :  { %1375 = vtanh.f32 %v912_v28 }
 0x1e5   :  { %1377 = vtanh.f32 %v961_v48 }
 0x1e7   :  { %v2243_v10 = vpop.f32.mrf.mxu2 }
 0x1e8   :  { %v2245_v21 = vpop.f32.mrf.mxu3 }
 0x1e9   :  { %v913_v14 = vpop.f32.mrf.mxu0 }
 0x1ea   :  { %v962_v0 = vpop.f32.mrf.mxu1  ;;  %v914_v36 = vadd.f32 %v913_v14, %v782_v42  ;;  %v1376_v51 = vpop.eup %1375 }
 0x1eb   :  { %v963_v61 = vadd.f32 %v962_v0, %v782_v42  ;;  %v1378_v27 = vpop.eup %1377  ;;  %v1081_v42 = vpop.permute.xlu1 %1080 }
 0x1ec   :  { %1379 = vtanh.f32 %v914_v36 }
 0x1ed   :  { %1381 = vtanh.f32 %v963_v61 }
 0x1ef   :  { %v2251_v52 = vpop.f32.mrf.mxu2 }
 0x1f0   :  { %v2255_v57 = vpop.f32.mrf.mxu3 }
 0x1f1   :  { %v916_v12 = vpop.f32.mrf.mxu0 }
 0x1f2   :  { %v965_v7 = vpop.f32.mrf.mxu1  ;;  %v917_v43 = vadd.f32 %v916_v12, %v787_v49  ;;  %v1380_v5 = vpop.eup %1379 }
 0x1f3   :  { %v966_v19 = vadd.f32 %v965_v7, %v787_v49  ;;  %v1382_v41 = vpop.eup %1381  ;;  %v1130_v16 = vmul.f32 %v1380_v5, %v1056_v33  ;;  %v1128_v7 = vmul.f32 %v1376_v51, %v1051_v1  ;;  %v1091_v51 = vpop.permute.xlu0 %1090 }
 0x1f4   :  { %1383 = vtanh.f32 %v917_v43  ;;  %v1131_v0 = vmul.f32 %v1382_v41, %v1056_v33  ;;  %v934_v33 = vadd.f32 %v2251_v52, %v2247_v38  ;;  %v1096_v5 = vpop.permute.xlu1 %1095 }
 0x1f5   :  { %1385 = vtanh.f32 %v966_v19  ;;  %v1160_v28 = vadd.f32 %v1130_v16, %v1128_v7 }
 0x1f7   :  { %v2261_v17 = vpop.f32.mrf.mxu2 }
 0x1f8   :  { %v2263_v25 = vpop.f32.mrf.mxu3  ;;  %v937_v52 = vadd.f32 %v2261_v17, %v2249_v15 }
 0x1f9   :  { %v918_v35 = vpop.f32.mrf.mxu0 }
 0x1fa   :  { %v967_v23 = vpop.f32.mrf.mxu1  ;;  %v919_v30 = vadd.f32 %v918_v35, %v792_v24 }
 0x1fb   :  { %v968_v18 = vadd.f32 %v967_v23, %v792_v24  ;;  %v1384_v24 = vpop.eup %1383  ;;  %v2289_v23 = vpop.permute.xlu2 %1085 }
 0x1fc   :  { %1387 = vtanh.f32 %v919_v30  ;;  %v1386_v11 = vpop.eup %1385  ;;  %v1132_v35 = vmul.f32 %v1384_v24, %v1061_v34 }
 0x1fd   :  { %1389 = vtanh.f32 %v968_v18 }
 0x1ff   :  { %v2269_v60 = vpop.f32.mrf.mxu2 }
 0x200   :  { %v2271_v31 = vpop.f32.mrf.mxu3 }
 0x201   :  { %v921_v39 = vpop.f32.mrf.mxu0  ;;  %v988_v17 = vadd.f32 %v2271_v31, %v2253_v56 }
 0x202   :  { %v970_v20 = vpop.f32.mrf.mxu1  ;;  %v922_v58 = vadd.f32 %v921_v39, %v797_v29  ;;  %v1388_v14 = vpop.eup %1387  ;;  %v1129_v39 = vmul.f32 %v1378_v27, %v1051_v1  ;;  %v983_v1 = vadd.f32 %v2255_v57, %v2247_v38 }
 0x203   :  { %v971_v37 = vadd.f32 %v970_v20, %v797_v29  ;;  %v932_v29 = vadd.f32 %v2243_v10, %v2241_v13  ;;  %v1390_v12 = vpop.eup %1389  ;;  %v1133_v10 = vmul.f32 %v1386_v11, %v1061_v34  ;;  %v1134_v48 = vmul.f32 %v1388_v14, %v1066_v2 }
 0x204   :  { %1391 = vtanh.f32 %v922_v58  ;;  %v1181_v61 = vadd.f32 %v1131_v0, %v1129_v39  ;;  %v1161_v34 = vadd.f32 %v1160_v28, %v1132_v35  ;;  %v1101_v0 = vpop.permute.xlu2 %1100 }
 0x205   :  { %1393 = vtanh.f32 %v971_v37 }
 0x207   :  { %v2273_v8 = vpop.f32.mrf.mxu2 }
 0x208   :  { %v2275_v46 = vpop.f32.mrf.mxu3 }
 0x209   :  { %v923_v40 = vpop.f32.mrf.mxu0 }
 0x20a   :  { %v972_v9 = vpop.f32.mrf.mxu1  ;;  %v924_v4 = vadd.f32 %v923_v40, %v802_v50  ;;  %v1135_v40 = vmul.f32 %v1390_v12, %v1066_v2 }
 0x20b   :  { %v973_v55 = vadd.f32 %v972_v9, %v802_v50  ;;  %v981_v50 = vadd.f32 %v2245_v21, %v2241_v13 }
 0x20c   :  { %1395 = vtanh.f32 %v924_v4  ;;  %v1182_v4 = vadd.f32 %v1181_v61, %v1133_v10  ;;  %v1111_v61 = vpop.permute.xlu1 %1110 }
 0x20d   :  { %1397 = vtanh.f32 %v973_v55  ;;  %v986_v55 = vadd.f32 %v2263_v25, %v2249_v15  ;;  %v942_v25 = vadd.f32 %v2273_v8, %v2257_v45 }
 0x20f   :  { %v2279_v3 = vpop.f32.mrf.mxu2 }
 0x210   :  { %v2281_v63 = vpop.f32.mrf.mxu3 }
 0x211   :  { %v926_v54 = vpop.f32.mrf.mxu0  ;;  %v993_v31 = vadd.f32 %v2281_v63, %v2259_v62  ;;  %v1106_v63 = vpop.permute.xlu0 %1105 }
 0x212   :  { %v927_v32 = vadd.f32 %v926_v54, %v2237_v26  ;;  %v975_v6 = vpop.f32.mrf.mxu1  ;;  %v1162_v54 = vadd.f32 %v1161_v34, %v1134_v48 }
 0x213   :  { %v976_v49 = vadd.f32 %v975_v6, %v2237_v26  ;;  %v1392_v26 = vpop.eup %1391 }
 0x214   :  { %1399 = vtanh.f32 %v927_v32  ;;  %v1394_v20 = vpop.eup %1393  ;;  %v1136_v18 = vmul.f32 %v1392_v26, %v2277_v22  ;;  %v939_v32 = vadd.f32 %v2269_v60, %v2253_v56 }
 0x215   :  { %1401 = vtanh.f32 %v976_v49  ;;  %v1396_v36 = vpop.eup %1395  ;;  %v1137_v2 = vmul.f32 %v1394_v20, %v2277_v22 }
 0x216   :  { %1403 = vtanh.f32 %v932_v29  ;;  %v1398_v30 = vpop.eup %1397  ;;  %v1138_v38 = vmul.f32 %v1396_v36, %v1076_v53  ;;  %v1163_v22 = vadd.f32 %v1162_v54, %v1136_v18  ;;  %v991_v29 = vadd.f32 %v2275_v46, %v2257_v45 }
 0x217   :  { %1405 = vtanh.f32 %v981_v50  ;;  %v946_v13 = vpop.f32.mrf.mxu2  ;;  %v1139_v6 = vmul.f32 %v1398_v30, %v1076_v53  ;;  %v944_v50 = vadd.f32 %v2279_v3, %v2259_v62 }
 0x218   :  { %v995_v43 = vpop.f32.mrf.mxu3  ;;  %v1164_v11 = vadd.f32 %v1163_v22, %v1138_v38  ;;  %v947_v46 = vadd.f32 %v946_v13, %v2265_v44 }
 0x219   :  { %v928_v21 = vpop.f32.mrf.mxu0  ;;  %v996_v26 = vadd.f32 %v995_v43, %v2265_v44 }
 0x21a   :  { %v929_v9 = vadd.f32 %v928_v21, %v2239_v59  ;;  %v977_v19 = vpop.f32.mrf.mxu1  ;;  %v1400_v37 = vpop.eup %1399 }
 0x21b   :  { %v978_v58 = vadd.f32 %v977_v19, %v2239_v59  ;;  %v1402_v27 = vpop.eup %1401  ;;  %v1183_v59 = vadd.f32 %v1182_v4, %v1135_v40  ;;  %v1140_v49 = vmul.f32 %v1400_v37, %v1081_v42 }
 0x21c   :  { %1407 = vtanh.f32 %v929_v9  ;;  %v1404_v57 = vpop.eup %1403  ;;  %v1141_v24 = vmul.f32 %v1402_v27, %v1081_v42 }
 0x21d   :  { %1409 = vtanh.f32 %v978_v58  ;;  %v1406_v41 = vpop.eup %1405  ;;  %v1184_v15 = vadd.f32 %v1183_v59, %v1137_v2  ;;  %v1165_v16 = vadd.f32 %v1164_v11, %v1140_v49  ;;  %v1144_v3 = vmul.f32 %v1404_v57, %v1091_v51 }
 0x21e   :  { %1411 = vtanh.f32 %v934_v33  ;;  %v1145_v10 = vmul.f32 %v1406_v41, %v1091_v51 }
 0x21f   :  { %1413 = vtanh.f32 %v983_v1  ;;  %v1185_v53 = vadd.f32 %v1184_v15, %v1139_v6  ;;  %v948_v42 = vpop.f32.mrf.mxu2  ;;  %v1121_v6 = vpop.permute.xlu0 %1120 }
 0x220   :  { %1415 = vtanh.f32 %v937_v52  ;;  %v997_v7 = vpop.f32.mrf.mxu3  ;;  %v949_v28 = vadd.f32 %v948_v42, %v2267_v47 }
 0x221   :  { %1417 = vtanh.f32 %v986_v55  ;;  %v1186_v45 = vadd.f32 %v1185_v53, %v1141_v24  ;;  %v1116_v55 = vpop.permute.xlu2 %1115 }
 0x222   :  { %v1408_v60 = vpop.eup %1407  ;;  %1419 = vtanh.f32 %v939_v32 }
 0x223   :  { %v1410_v56 = vpop.eup %1409  ;;  %1421 = vtanh.f32 %v988_v17  ;;  %v1142_v8 = vmul.f32 %v1408_v60, %v2289_v23 }
 0x224   :  { %v1412_v14 = vpop.eup %1411  ;;  %1423 = vtanh.f32 %v942_v25  ;;  %v1143_v12 = vmul.f32 %v1410_v56, %v2289_v23  ;;  %v998_v23 = vadd.f32 %v997_v7, %v2267_v47  ;;  %v1126_v25 = vpop.permute.xlu1 %1125 }
 0x225   :  { %v1414_v35 = vpop.eup %1413  ;;  %1425 = vtanh.f32 %v991_v29  ;;  %v1166_v39 = vadd.f32 %v1165_v16, %v1142_v8  ;;  %v1146_v21 = vmul.f32 %v1412_v14, %v1096_v5 }
 0x226   :  { %v1416_v62 = vpop.eup %1415  ;;  %1427 = vtanh.f32 %v944_v50  ;;  %v1187_v20 = vadd.f32 %v1186_v45, %v1143_v12  ;;  %v1147_v33 = vmul.f32 %v1414_v35, %v1096_v5 }
 0x227   :  { %v1418_v48 = vpop.eup %1417  ;;  %1429 = vtanh.f32 %v993_v31  ;;  %v1167_v13 = vadd.f32 %v1166_v39, %v1144_v3  ;;  %v1148_v43 = vmul.f32 %v1416_v62, %v1101_v0  ;;  %v1203_v3 = vstv %s2333_s6 }
 0x228   :  { %v1420_v36 = vpop.eup %1419  ;;  %1431 = vtanh.f32 %v947_v46  ;;  %v1188_v40 = vadd.f32 %v1187_v20, %v1145_v10  ;;  %v1149_v30 = vmul.f32 %v1418_v48, %v1101_v0  ;;  %v1212_v62 = vlaneseq }
 0x229   :  { %v1422_v44 = vpop.eup %1421  ;;  %1433 = vtanh.f32 %v996_v26  ;;  %v1168_v9 = vadd.f32 %v1167_v13, %v1146_v21  ;;  %v1150_v18 = vmul.f32 %v1420_v36, %v1106_v63 }
 0x22a   :  { %v1424_v19 = vpop.eup %1423  ;;  %v1189_v1 = vadd.f32 %v1188_v40, %v1147_v33  ;;  %1435 = vtanh.f32 %v949_v28  ;;  %v1151_v51 = vmul.f32 %v1422_v44, %v1106_v63  ;;  %vm1214_vm1 = vcmp.lt.s32.totalorder %v1212_v62, 256 }
 0x22b   :  { %v1426_v34 = vpop.eup %1425  ;;  %v1169_v58 = vadd.f32 %v1168_v9, %v1148_v43  ;;  %1437 = vtanh.f32 %v998_v23  ;;  %v1152_v52 = vmul.f32 %v1424_v19, %v1111_v61 }
 0x22c   :  { %v1428_v37 = vpop.eup %1427  ;;  %v1190_v47 = vadd.f32 %v1189_v1, %v1149_v30  ;;  %v1153_v54 = vmul.f32 %v1426_v34, %v1111_v61 }
 0x22d   :  { %v1430_v4 = vpop.eup %1429  ;;  %v1170_v2 = vadd.f32 %v1169_v58, %v1150_v18  ;;  %v1154_v5 = vmul.f32 %v1428_v37, %v1116_v55 }
 0x22e   :  { %v1432_v27 = vpop.eup %1431  ;;  %v1191_v38 = vadd.f32 %v1190_v47, %v1151_v51  ;;  %v1155_v41 = vmul.f32 %v1430_v4, %v1116_v55 }
 0x22f   :  { %v1434_v57 = vpop.eup %1433  ;;  %v1171_v59 = vadd.f32 %v1170_v2, %v1152_v52  ;;  %v1156_v49 = vmul.f32 %v1432_v27, %v1121_v6 }
 0x230   :  { %v1436_v32 = vpop.eup %1435  ;;  %v1192_v17 = vadd.f32 %v1191_v38, %v1153_v54  ;;  %v1157_v24 = vmul.f32 %v1434_v57, %v1121_v6 }
 0x231   :  { %v1438_v22 = vpop.eup %1437  ;;  %v1172_v15 = vadd.f32 %v1171_v59, %v1154_v5  ;;  %v1158_v11 = vmul.f32 %v1436_v32, %v1126_v25 }
 0x232   :  { %v1193_v29 = vadd.f32 %v1192_v17, %v1155_v41  ;;  %v1159_v53 = vmul.f32 %v1438_v22, %v1126_v25 }
 0x233   :  { %v1173_v60 = vadd.f32 %v1172_v15, %v1156_v49 }
 0x234   :  { %v1194_v50 = vadd.f32 %v1193_v29, %v1157_v24 }
 0x235   :  { %v1174_v56 = vadd.f32 %v1173_v60, %v1158_v11 }
 0x236   :  { %v1195_v31 = vadd.f32 %v1194_v50, %v1159_v53 }
 0x237   :  { %v1175_v16 = vrot.slane %v1174_v56, 4 }
 0x238   :  { %v1196_v8 = vrot.slane %v1195_v31, 4 }
 0x239   :  { %v1176_v42 = vadd.f32 %v1175_v16, %v1174_v56 }
 0x23a   :  { %v1197_v14 = vadd.f32 %v1196_v8, %v1195_v31 }
 0x23b   :  { %v1177_v0 = vrot.slane %v1176_v42, 2 }
 0x23c   :  { %v1198_v45 = vrot.slane %v1197_v14, 2 }
 0x23d   :  { %v1178_v46 = vadd.f32 %v1177_v0, %v1176_v42 }
 0x23e   :  { %v1199_v12 = vadd.f32 %v1198_v45, %v1197_v14 }
 0x23f   :  { %v1179_v7 = vrot.slane %v1178_v46, 1 }
 0x240   :  { %v1200_v35 = vrot.slane %v1199_v12, 1 }
 0x241   :  { %v1180_v26 = vadd.f32 %v1179_v7, %v1178_v46 }
 0x242   :  { %v1201_v39 = vadd.f32 %v1200_v35, %v1199_v12 }
 0x243   :  { %v1204_v10 = vadd.f32 %v1203_v3, %v1180_v26 }
 0x244   :  { %v1205_v63 = vadd.f32 %v1203_v3, %v1201_v39 }
 0x246   :  { %v1208_v20 = vrot.slane %v1205_v63, 7 }
 0x248   :  { %v1210_v28 = vsel %vm1209_vm0, %v1204_v10, %v1208_v20 }
 0x249   :  { %1216 = vst.msk [vmem:[#allocation3] sm:$0x3] %vm1214_vm1, %v1210_v28 }
 0x24a   :  { %1227 = dma.vmem_to_hbm [thread:$0]  %s1223_s19, 32, %s1225_s21, [#allocation4]  }
 0x24b   :  { %1463 = dma.done.wait [#allocation4], 32  }
 0x24c   :  { %1464 = vsyncadd [#allocation4], 4294967264 }
 0x24d   :  { %1232 = vsyncpa [#allocation4], 1 }

</bundles_post_ra>
